<compile_context>
chip_gen: v7x
topology: tpu7x:2x2x1
jax: 0.10.0
libtpu: 0.0.40
codegen_flags: <defaults>
</compile_context>

<pallas_src>
import math

import jax
import jax.numpy as jnp
from jax.experimental import pallas as pl
from jax.experimental.pallas import tpu as pltpu


def _round_up(x, m):
    return (x + m - 1) // m * m


def _pick_tb(B, S, I, H, A, budget_bytes=24 << 20):
    """VMEM-aware batch-tile size (multiple of 8, capped at 256 rows)."""
    w_out = _round_up(3 * H + S, 128)
    # Rough f32 bytes per batch row kept live: double-buffered ctx / ph / pc /
    # packed output, plus the (S, A) attention temporaries and gate scratch.
    per_row = 4 * (2 * S * I          # contexts, 2 pipeline buffers
                   + 2 * (2 * H)      # prev_hidden / prev_cell buffers
                   + 2 * w_out        # packed output buffers
                   + 2 * S * A        # ca / tanh temporaries
                   + 4 * H + 2 * I)   # gates / weighted-context scratch
    tb = (budget_bytes // max(per_row, 1)) // 8 * 8
    tb = max(8, min(256, tb))
    tb = min(tb, _round_up(B, 8))
    # Prefer >=2 parallel grid steps when the batch is big enough so the
    # "parallel" axis can be sharded across both TensorCores on v7x.
    b_pad8 = _round_up(B, 8)
    if b_pad8 > 8 and _round_up(b_pad8, tb) // tb < 2:
        tb = max(8, _round_up(b_pad8 // 2, 8))
    return tb


def _attention_kernel(ph_ref, pc_ref, ctx_ref,
                      wh_ref, wc_ref, bhc_ref, we_ref,
                      wg_ref, bg_ref, wp_ref, bp_ref,
                      out_ref):
    TB, S, I = ctx_ref.shape
    H = ph_ref.shape[-1]
    A = wh_ref.shape[-1]
    W = out_ref.shape[-1]
    f32 = jnp.float32

    ph = ph_ref[...]                                   # (TB, H)
    pc = pc_ref[...]                                   # (TB, H)
    ctx3 = ctx_ref[...]                                # (TB, S, I)
    # Leading-dim collapse; layout-free when S is a multiple of 8 (sublanes).
    ctx2 = ctx3.reshape(TB * S, I)                     # row t*S + s

    # --- attention energies (single pass) -------------------------------------
    ha = jnp.dot(ph, wh_ref[...], preferred_element_type=f32) + bhc_ref[...]    # (TB, A)
    ca = jnp.dot(ctx2, wc_ref[...], preferred_element_type=f32)                 # (TB*S, A)
    t_all = jnp.tanh(ca.reshape(TB, S, A) + ha[:, None, :])                     # (TB, S, A)
    # `be` dropped (softmax shift invariance).  VPU mul + XLU lane-reduce
    # instead of S one-lane-wide MXU matmuls.
    energy = jnp.sum(t_all * we_ref[...].reshape(1, 1, A), axis=-1)             # (TB, S)

    # --- softmax over the sequence axis (lanes) --------------------------------
    e_max = jnp.max(energy, axis=-1, keepdims=True)
    p = jnp.exp(energy - e_max)
    inv_l = pl.reciprocal(jnp.sum(p, axis=-1, keepdims=True), approx=True)
    aw = p * inv_l                                                              # (TB, S)

    # --- attention-weighted context --------------------------------------------
    wctx = jnp.sum(aw[:, :, None] * ctx3, axis=1)                               # (TB, I)

    # --- LSTM cell, gates in one fused matmul (order i, f, g, o) ---------------
    # wg = concat([(W_ih[:, :H] + W_hh).T ; W_ih[:, H:].T]) pre-built in wrapper.
    hx = jnp.concatenate([ph, wctx], axis=-1)                                   # (TB, H+I)
    gates = jnp.dot(hx, wg_ref[...], preferred_element_type=f32) + bg_ref[...]  # (TB, 4H)
    i_g = jax.nn.sigmoid(gates[:, 0:H])
    f_g = jax.nn.sigmoid(gates[:, H:2 * H])
    g_g = jnp.tanh(gates[:, 2 * H:3 * H])
    o_g = jax.nn.sigmoid(gates[:, 3 * H:4 * H])
    c_new = f_g * pc + i_g * g_g                                                # (TB, H)
    h_new = o_g * jnp.tanh(c_new)                                               # (TB, H)

    # --- output projection of [hidden, weighted_context], fused matmul ---------
    hc = jnp.concatenate([h_new, wctx], axis=-1)                                # (TB, H+I)
    out = jnp.dot(hc, wp_ref[...], preferred_element_type=f32) + bp_ref[...]    # (TB, H)

    # --- pack everything into one lane-dense slab, single full-width store -----
    pad = W - (3 * H + S)
    parts = [out, h_new, c_new, aw]
    if pad:
        parts.append(jnp.zeros((TB, pad), f32))
    out_ref[...] = jnp.concatenate(parts, axis=-1)


def attention_forward(prev_hidden, prev_cell, contexts, params):
    B, S, I = contexts.shape
    H = prev_hidden.shape[-1]
    A = params["Wh"].shape[0]

    TB = _pick_tb(B, S, I, H, A)
    B_pad = _round_up(B, TB)
    pad_b = B_pad - B

    ph = jnp.pad(prev_hidden.astype(jnp.float32), ((0, pad_b), (0, 0)))
    pc = jnp.pad(prev_cell.astype(jnp.float32), ((0, pad_b), (0, 0)))
    ctx = jnp.pad(contexts.astype(jnp.float32), ((0, pad_b), (0, 0), (0, 0)))

    # Pre-transpose / fold / fuse weights so every in-kernel matmul is x @ W.
    WhT = params["Wh"].T                               # (H, A)
    WcT = params["Wc"].T                               # (I, A)
    bhc = (params["bh"] + params["bc"]).reshape(1, A)  # bh + bc folded
    we_row = params["We"].reshape(1, A)                # energy weights as a lane row
    # `be` dropped: softmax is shift invariant -> exact no-op.
    Wih = params["W_ih"]                               # (4H, H+I)
    Wg = jnp.concatenate([(Wih[:, :H] + params["W_hh"]).T,   # (H, 4H)  pre-summed
                          Wih[:, H:].T], axis=0)             # (I, 4H)  -> (H+I, 4H)
    bg = (params["b_ih"] + params["b_hh"]).reshape(1, 4 * H)
    WpT = params["Wp"].T                               # (H+I, H)
    bp = params["bp"].reshape(1, H)

    W_out = _round_up(3 * H + S, 128)                  # lane-dense packed width

    def row_spec(shape):
        return pl.BlockSpec(shape, lambda g: (g, 0))

    def full_spec(arr):
        return pl.BlockSpec(arr.shape, lambda g: (0, 0))

    grid_spec = pltpu.PrefetchScalarGridSpec(
        num_scalar_prefetch=0,
        grid=(B_pad // TB,),
        in_specs=[
            row_spec((TB, H)),                                   # prev_hidden
            row_spec((TB, H)),                                   # prev_cell
            pl.BlockSpec((TB, S, I), lambda g: (g, 0, 0)),       # contexts (no transpose)
            full_spec(WhT), full_spec(WcT), full_spec(bhc), full_spec(we_row),
            full_spec(Wg), full_spec(bg),
            full_spec(WpT), full_spec(bp),
        ],
        out_specs=row_spec((TB, W_out)),
    )
    packed = pl.pallas_call(
        _attention_kernel,
        out_shape=jax.ShapeDtypeStruct((B_pad, W_out), jnp.float32),
        grid_spec=grid_spec,
        compiler_params=pltpu.CompilerParams(
            dimension_semantics=("parallel",),
            vmem_limit_bytes=48 << 20,                 # headroom for TB<=256; < v7x 64 MiB
        ),
    )(ph, pc, ctx, WhT, WcT, bhc, we_row, Wg, bg, WpT, bp)

    out = packed[:B, 0:H]
    hidden = packed[:B, H:2 * H]
    cell = packed[:B, 2 * H:3 * H]
    aw = packed[:B, 3 * H:3 * H + S]
    return out, hidden, cell, aw


def init_params(key, input_size, hidden_size, attention_size):
    """Deterministic PyTorch-style uniform(-1/sqrt(fan_in), 1/sqrt(fan_in)) init."""
    I, H, A = input_size, hidden_size, attention_size
    ks = jax.random.split(key, 12)

    def u(k, shape, fan_in):
        bound = 1.0 / math.sqrt(fan_in)
        return jax.random.uniform(k, shape, jnp.float32, -bound, bound)

    return {
        # nn.Linear(H, A)
        "Wh": u(ks[0], (A, H), H), "bh": u(ks[1], (A,), H),
        # nn.Linear(I, A)
        "Wc": u(ks[2], (A, I), I), "bc": u(ks[3], (A,), I),
        # nn.Linear(A, 1)
        "We": u(ks[4], (1, A), A), "be": u(ks[5], (1,), A),
        # nn.LSTMCell(I + H, H)  (PyTorch gate order: i, f, g, o)
        "W_ih": u(ks[6], (4 * H, H + I), H), "b_ih": u(ks[7], (4 * H,), H),
        "W_hh": u(ks[8], (4 * H, H), H), "b_hh": u(ks[9], (4 * H,), H),
        # nn.Linear(H + I, H)
        "Wp": u(ks[10], (H, H + I), H + I), "bp": u(ks[11], (H,), H + I),
    }


def reference_forward(prev_hidden, prev_cell, contexts, params):
    """Pure-JAX reference mirroring the PyTorch forward (including `be`)."""
    P = jax.lax.Precision.HIGHEST
    ha = jnp.dot(prev_hidden, params["Wh"].T, precision=P) + params["bh"]                 # (B, A)
    ca = jnp.einsum("bsi,ai->bsa", contexts, params["Wc"], precision=P) + params["bc"]    # (B, S, A)
    energy = (jnp.einsum("bsa,a->bs", jnp.tanh(ha[:, None, :] + ca),
                         params["We"][0], precision=P) + params["be"][0])                 # (B, S)
    aw = jax.nn.softmax(energy, axis=1)
    wctx = jnp.einsum("bs,bsi->bi", aw, contexts, precision=P)                            # (B, I)
    rnn_in = jnp.concatenate([prev_hidden, wctx], axis=1)
    gates = (jnp.dot(rnn_in, params["W_ih"].T, precision=P) + params["b_ih"]
             + jnp.dot(prev_hidden, params["W_hh"].T, precision=P) + params["b_hh"])
    i_g, f_g, g_g, o_g = jnp.split(gates, 4, axis=1)
    i_g, f_g, o_g = jax.nn.sigmoid(i_g), jax.nn.sigmoid(f_g), jax.nn.sigmoid(o_g)
    g_g = jnp.tanh(g_g)
    cell = f_g * prev_cell + i_g * g_g
    hidden = o_g * jnp.tanh(cell)
    out = (jnp.dot(jnp.concatenate([hidden, wctx], axis=1), params["Wp"].T, precision=P)
           + params["bp"])
    return out, hidden, cell, aw


if __name__ == "__main__":
    B, S = 2, 8
    input_size, hidden_size, attention_size = 32, 32, 128

    key = jax.random.PRNGKey(0)
    k1, k2, k3, kp = jax.random.split(key, 4)
    prev_hidden = jax.random.normal(k1, (B, hidden_size), jnp.float32)
    prev_cell = jax.random.normal(k2, (B, hidden_size), jnp.float32)
    contexts = jax.random.normal(k3, (B, S, input_size), jnp.float32)
    params = init_params(kp, input_size, hidden_size, attention_size)

    outs = attention_forward(prev_hidden, prev_cell, contexts, params)
    outs = jax.block_until_ready(outs)

    refs = reference_forward(prev_hidden, prev_cell, contexts, params)
    for o, r in zip(outs, refs):
        assert o.shape == r.shape, (o.shape, r.shape)
        assert jnp.allclose(o, r, atol=2e-3, rtol=2e-3), float(jnp.max(jnp.abs(o - r)))

    print("KERNEL_OK")
</pallas_src>

<mosaic_0001>
module attributes {stable_mosaic.version = 11 : i64} {
  func.func @_attention_kernel(%arg0: i32, %arg1: memref<8x32xf32, #tpu.memory_space<vmem>>, %arg2: memref<8x32xf32, #tpu.memory_space<vmem>>, %arg3: memref<8x8x32xf32, #tpu.memory_space<vmem>>, %arg4: memref<32x128xf32, #tpu.memory_space<vmem>>, %arg5: memref<32x128xf32, #tpu.memory_space<vmem>>, %arg6: memref<1x128xf32, #tpu.memory_space<vmem>>, %arg7: memref<1x128xf32, #tpu.memory_space<vmem>>, %arg8: memref<64x128xf32, #tpu.memory_space<vmem>>, %arg9: memref<1x128xf32, #tpu.memory_space<vmem>>, %arg10: memref<64x32xf32, #tpu.memory_space<vmem>>, %arg11: memref<1x32xf32, #tpu.memory_space<vmem>>, %arg12: memref<8x128xf32, #tpu.memory_space<vmem>>) attributes {dimension_semantics = [#tpu.dimension_semantics<parallel>], iteration_bounds = array<i64: 1>, scalar_prefetch = 0 : i64, scratch_operands = 0 : i64, tpu.core_type = #tpu.core_type<tc>, window_params = [{transform_indices = @transform_0, window_bounds = array<i64: 8, 32>}, {transform_indices = @transform_1, window_bounds = array<i64: 8, 32>}, {transform_indices = @transform_2, window_bounds = array<i64: 8, 8, 32>}, {pipeline_mode = #tpu.pipeline_mode<synchronous>, transform_indices = @transform_3, window_bounds = array<i64: 32, 128>}, {pipeline_mode = #tpu.pipeline_mode<synchronous>, transform_indices = @transform_4, window_bounds = array<i64: 32, 128>}, {pipeline_mode = #tpu.pipeline_mode<synchronous>, transform_indices = @transform_5, window_bounds = array<i64: 1, 128>}, {pipeline_mode = #tpu.pipeline_mode<synchronous>, transform_indices = @transform_6, window_bounds = array<i64: 1, 128>}, {pipeline_mode = #tpu.pipeline_mode<synchronous>, transform_indices = @transform_7, window_bounds = array<i64: 64, 128>}, {pipeline_mode = #tpu.pipeline_mode<synchronous>, transform_indices = @transform_8, window_bounds = array<i64: 1, 128>}, {pipeline_mode = #tpu.pipeline_mode<synchronous>, transform_indices = @transform_9, window_bounds = array<i64: 64, 32>}, {pipeline_mode = #tpu.pipeline_mode<synchronous>, transform_indices = @transform_10, window_bounds = array<i64: 1, 32>}, {transform_indices = @transform_11, window_bounds = array<i64: 8, 128>}]} {
    %c0 = arith.constant 0 : index
    %c0_0 = arith.constant 0 : index
    %0 = vector.load %arg1[%c0, %c0_0] : memref<8x32xf32, #tpu.memory_space<vmem>>, vector<8x32xf32>
    %c0_1 = arith.constant 0 : index
    %c0_2 = arith.constant 0 : index
    %1 = vector.load %arg2[%c0_1, %c0_2] : memref<8x32xf32, #tpu.memory_space<vmem>>, vector<8x32xf32>
    %c0_3 = arith.constant 0 : index
    %c0_4 = arith.constant 0 : index
    %c0_5 = arith.constant 0 : index
    %2 = vector.load %arg3[%c0_3, %c0_4, %c0_5] : memref<8x8x32xf32, #tpu.memory_space<vmem>>, vector<8x8x32xf32>
    %3 = vector.shape_cast %2 : vector<8x8x32xf32> to vector<64x32xf32>
    %c0_6 = arith.constant 0 : index
    %c0_7 = arith.constant 0 : index
    %4 = vector.load %arg4[%c0_6, %c0_7] : memref<32x128xf32, #tpu.memory_space<vmem>>, vector<32x128xf32>
    %cst = arith.constant dense<0.000000e+00> : vector<8x128xf32>
    %5 = tpu.matmul %0, %4, %cst {dimension_numbers = #tpu.dot_dimension_numbers<[1], [0], [0], [1], [0, 0, 1, 1], [], []>} : vector<8x32xf32>, vector<32x128xf32>, vector<8x128xf32> -> vector<8x128xf32>
    %c0_8 = arith.constant 0 : index
    %c0_9 = arith.constant 0 : index
    %6 = vector.load %arg6[%c0_8, %c0_9] : memref<1x128xf32, #tpu.memory_space<vmem>>, vector<1x128xf32>
    %7 = vector.broadcast %6 : vector<1x128xf32> to vector<8x128xf32>
    %8 = arith.addf %5, %7 : vector<8x128xf32>
    %c0_10 = arith.constant 0 : index
    %c0_11 = arith.constant 0 : index
    %9 = vector.load %arg5[%c0_10, %c0_11] : memref<32x128xf32, #tpu.memory_space<vmem>>, vector<32x128xf32>
    %cst_12 = arith.constant dense<0.000000e+00> : vector<64x128xf32>
    %10 = tpu.matmul %3, %9, %cst_12 {dimension_numbers = #tpu.dot_dimension_numbers<[1], [0], [0], [1], [0, 0, 1, 1], [], []>} : vector<64x32xf32>, vector<32x128xf32>, vector<64x128xf32> -> vector<64x128xf32>
    %11 = vector.shape_cast %10 : vector<64x128xf32> to vector<8x8x128xf32>
    %12 = vector.shape_cast %8 : vector<8x128xf32> to vector<8x1x128xf32>
    %13 = vector.broadcast %12 : vector<8x1x128xf32> to vector<8x8x128xf32>
    %14 = arith.addf %11, %13 : vector<8x8x128xf32>
    %15 = math.tanh %14 : vector<8x8x128xf32>
    %c0_13 = arith.constant 0 : index
    %c0_14 = arith.constant 0 : index
    %16 = vector.load %arg7[%c0_13, %c0_14] : memref<1x128xf32, #tpu.memory_space<vmem>>, vector<1x128xf32>
    %17 = vector.shape_cast %16 : vector<1x128xf32> to vector<1x1x128xf32>
    %18 = vector.broadcast %17 : vector<1x1x128xf32> to vector<8x8x128xf32>
    %19 = arith.mulf %15, %18 : vector<8x8x128xf32>
    %cst_15 = arith.constant dense<0.000000e+00> : vector<8x8xf32>
    %20 = vector.multi_reduction <add>, %19, %cst_15 [2] : vector<8x8x128xf32> to vector<8x8xf32>
    %cst_16 = arith.constant dense<0xFF800000> : vector<8xf32>
    %21 = vector.multi_reduction <maximumf>, %20, %cst_16 [1] : vector<8x8xf32> to vector<8xf32>
    %22 = vector.shape_cast %21 : vector<8xf32> to vector<8x1xf32>
    %23 = vector.broadcast %22 : vector<8x1xf32> to vector<8x8xf32>
    %24 = arith.subf %20, %23 : vector<8x8xf32>
    %25 = math.exp %24 : vector<8x8xf32>
    %cst_17 = arith.constant dense<0.000000e+00> : vector<8xf32>
    %26 = vector.multi_reduction <add>, %25, %cst_17 [1] : vector<8x8xf32> to vector<8xf32>
    %27 = vector.shape_cast %26 : vector<8xf32> to vector<8x1xf32>
    %28 = tpu.reciprocal %27 {approx = true} : vector<8x1xf32> -> vector<8x1xf32>
    %29 = vector.broadcast %28 : vector<8x1xf32> to vector<8x8xf32>
    %30 = arith.mulf %25, %29 : vector<8x8xf32>
    %31 = vector.shape_cast %30 : vector<8x8xf32> to vector<8x8x1xf32>
    %32 = vector.broadcast %31 : vector<8x8x1xf32> to vector<8x8x32xf32>
    %33 = arith.mulf %32, %2 : vector<8x8x32xf32>
    %cst_18 = arith.constant dense<0.000000e+00> : vector<8x32xf32>
    %34 = vector.multi_reduction <add>, %33, %cst_18 [1] : vector<8x8x32xf32> to vector<8x32xf32>
    %35 = tpu.concatenate %0, %34 in 1 : vector<8x32xf32>, vector<8x32xf32> -> vector<8x64xf32>
    %c0_19 = arith.constant 0 : index
    %c0_20 = arith.constant 0 : index
    %36 = vector.load %arg8[%c0_19, %c0_20] : memref<64x128xf32, #tpu.memory_space<vmem>>, vector<64x128xf32>
    %cst_21 = arith.constant dense<0.000000e+00> : vector<8x128xf32>
    %37 = tpu.matmul %35, %36, %cst_21 {dimension_numbers = #tpu.dot_dimension_numbers<[1], [0], [0], [1], [0, 0, 1, 1], [], []>} : vector<8x64xf32>, vector<64x128xf32>, vector<8x128xf32> -> vector<8x128xf32>
    %c0_22 = arith.constant 0 : index
    %c0_23 = arith.constant 0 : index
    %38 = vector.load %arg9[%c0_22, %c0_23] : memref<1x128xf32, #tpu.memory_space<vmem>>, vector<1x128xf32>
    %39 = vector.broadcast %38 : vector<1x128xf32> to vector<8x128xf32>
    %40 = arith.addf %37, %39 : vector<8x128xf32>
    %41 = vector.extract_strided_slice %40 {offsets = [0, 0], sizes = [8, 32], strides = [1, 1]} : vector<8x128xf32> to vector<8x32xf32>
    %42 = arith.negf %41 : vector<8x32xf32>
    %43 = math.exp %42 : vector<8x32xf32>
    %cst_24 = arith.constant 1.000000e+00 : f32
    %44 = vector.broadcast %cst_24 : f32 to vector<8x32xf32>
    %45 = arith.addf %44, %43 : vector<8x32xf32>
    %46 = arith.divf %44, %45 : vector<8x32xf32>
    %47 = vector.extract_strided_slice %40 {offsets = [0, 32], sizes = [8, 32], strides = [1, 1]} : vector<8x128xf32> to vector<8x32xf32>
    %48 = arith.negf %47 : vector<8x32xf32>
    %49 = math.exp %48 : vector<8x32xf32>
    %cst_25 = arith.constant 1.000000e+00 : f32
    %50 = vector.broadcast %cst_25 : f32 to vector<8x32xf32>
    %51 = arith.addf %50, %49 : vector<8x32xf32>
    %52 = arith.divf %50, %51 : vector<8x32xf32>
    %53 = vector.extract_strided_slice %40 {offsets = [0, 64], sizes = [8, 32], strides = [1, 1]} : vector<8x128xf32> to vector<8x32xf32>
    %54 = math.tanh %53 : vector<8x32xf32>
    %55 = vector.extract_strided_slice %40 {offsets = [0, 96], sizes = [8, 32], strides = [1, 1]} : vector<8x128xf32> to vector<8x32xf32>
    %56 = arith.negf %55 : vector<8x32xf32>
    %57 = math.exp %56 : vector<8x32xf32>
    %cst_26 = arith.constant 1.000000e+00 : f32
    %58 = vector.broadcast %cst_26 : f32 to vector<8x32xf32>
    %59 = arith.addf %58, %57 : vector<8x32xf32>
    %60 = arith.divf %58, %59 : vector<8x32xf32>
    %61 = arith.mulf %52, %1 : vector<8x32xf32>
    %62 = arith.mulf %46, %54 : vector<8x32xf32>
    %63 = arith.addf %61, %62 : vector<8x32xf32>
    %64 = math.tanh %63 : vector<8x32xf32>
    %65 = arith.mulf %60, %64 : vector<8x32xf32>
    %66 = tpu.concatenate %65, %34 in 1 : vector<8x32xf32>, vector<8x32xf32> -> vector<8x64xf32>
    %c0_27 = arith.constant 0 : index
    %c0_28 = arith.constant 0 : index
    %67 = vector.load %arg10[%c0_27, %c0_28] : memref<64x32xf32, #tpu.memory_space<vmem>>, vector<64x32xf32>
    %cst_29 = arith.constant dense<0.000000e+00> : vector<8x32xf32>
    %68 = tpu.matmul %66, %67, %cst_29 {dimension_numbers = #tpu.dot_dimension_numbers<[1], [0], [0], [1], [0, 0, 1, 1], [], []>} : vector<8x64xf32>, vector<64x32xf32>, vector<8x32xf32> -> vector<8x32xf32>
    %c0_30 = arith.constant 0 : index
    %c0_31 = arith.constant 0 : index
    %69 = vector.load %arg11[%c0_30, %c0_31] : memref<1x32xf32, #tpu.memory_space<vmem>>, vector<1x32xf32>
    %70 = vector.broadcast %69 : vector<1x32xf32> to vector<8x32xf32>
    %71 = arith.addf %68, %70 : vector<8x32xf32>
    %cst_32 = arith.constant 0.000000e+00 : f32
    %72 = vector.broadcast %cst_32 : f32 to vector<8x24xf32>
    %73 = tpu.concatenate %71, %65, %63, %30, %72 in 1 : vector<8x32xf32>, vector<8x32xf32>, vector<8x32xf32>, vector<8x8xf32>, vector<8x24xf32> -> vector<8x128xf32>
    %c0_33 = arith.constant 0 : index
    %c0_34 = arith.constant 0 : index
    %74 = vector.load %arg12[%c0_33, %c0_34] : memref<8x128xf32, #tpu.memory_space<vmem>>, vector<8x128xf32>
    tpu.vector_store %arg12[%c0_33, %c0_34], %73 {strides = array<i32>} : memref<8x128xf32, #tpu.memory_space<vmem>>, vector<8x128xf32>,
    return
  }
  func.func @transform_0(%arg0: i32) -> (i32, i32) {
    %c0_i32 = arith.constant 0 : i32
    %c0_i32_0 = arith.constant 0 : i32
    return %arg0, %c0_i32 : i32, i32
  }
  func.func @transform_1(%arg0: i32) -> (i32, i32) {
    %c0_i32 = arith.constant 0 : i32
    %c0_i32_0 = arith.constant 0 : i32
    return %arg0, %c0_i32 : i32, i32
  }
  func.func @transform_2(%arg0: i32) -> (i32, i32, i32) {
    %c0_i32 = arith.constant 0 : i32
    %c0_i32_0 = arith.constant 0 : i32
    %c0_i32_1 = arith.constant 0 : i32
    return %arg0, %c0_i32, %c0_i32_0 : i32, i32, i32
  }
  func.func @transform_3(%arg0: i32) -> (i32, i32) {
    %c0_i32 = arith.constant 0 : i32
    %c0_i32_0 = arith.constant 0 : i32
    %c0_i32_1 = arith.constant 0 : i32
    return %c0_i32, %c0_i32_0 : i32, i32
  }
  func.func @transform_4(%arg0: i32) -> (i32, i32) {
    %c0_i32 = arith.constant 0 : i32
    %c0_i32_0 = arith.constant 0 : i32
    %c0_i32_1 = arith.constant 0 : i32
    return %c0_i32, %c0_i32_0 : i32, i32
  }
  func.func @transform_5(%arg0: i32) -> (i32, i32) {
    %c0_i32 = arith.constant 0 : i32
    %c0_i32_0 = arith.constant 0 : i32
    %c0_i32_1 = arith.constant 0 : i32
    return %c0_i32, %c0_i32_0 : i32, i32
  }
  func.func @transform_6(%arg0: i32) -> (i32, i32) {
    %c0_i32 = arith.constant 0 : i32
    %c0_i32_0 = arith.constant 0 : i32
    %c0_i32_1 = arith.constant 0 : i32
    return %c0_i32, %c0_i32_0 : i32, i32
  }
  func.func @transform_7(%arg0: i32) -> (i32, i32) {
    %c0_i32 = arith.constant 0 : i32
    %c0_i32_0 = arith.constant 0 : i32
    %c0_i32_1 = arith.constant 0 : i32
    return %c0_i32, %c0_i32_0 : i32, i32
  }
  func.func @transform_8(%arg0: i32) -> (i32, i32) {
    %c0_i32 = arith.constant 0 : i32
    %c0_i32_0 = arith.constant 0 : i32
    %c0_i32_1 = arith.constant 0 : i32
    return %c0_i32, %c0_i32_0 : i32, i32
  }
  func.func @transform_9(%arg0: i32) -> (i32, i32) {
    %c0_i32 = arith.constant 0 : i32
    %c0_i32_0 = arith.constant 0 : i32
    %c0_i32_1 = arith.constant 0 : i32
    return %c0_i32, %c0_i32_0 : i32, i32
  }
  func.func @transform_10(%arg0: i32) -> (i32, i32) {
    %c0_i32 = arith.constant 0 : i32
    %c0_i32_0 = arith.constant 0 : i32
    %c0_i32_1 = arith.constant 0 : i32
    return %c0_i32, %c0_i32_0 : i32, i32
  }
  func.func @transform_11(%arg0: i32) -> (i32, i32) {
    %c0_i32 = arith.constant 0 : i32
    %c0_i32_0 = arith.constant 0 : i32
    return %arg0, %c0_i32 : i32, i32
  }
}

</mosaic_0001>

<bundles_post_ra>
// kernel: tpu_custom_call.1
= control target key start
LH: loop header
LB: loop body
LE: loop exit
PB: predicated region body
PF: predicated region fallthrough
CT: control target
= control target key end

     0   :  { %16 = vsyncpa [#allocation3], 0  ;;  %s1905_s0 = inlined_call_operand.hbm [shape: f32[8,32], index: 0, kind: input, shape index: {}]   ;;  %s1906_s1 = inlined_call_operand.hbm [shape: f32[8,32], index: 1, kind: input, shape index: {}]   ;;  %s1907_s2 = inlined_call_operand.vmem [shape: f32[8,8,32], index: 2, kind: input, shape index: {}]   ;;  %s1908_s3 = inlined_call_operand.vmem [shape: f32[32,128], index: 3, kind: input, shape index: {}]   ;;  %s1909_s4 = inlined_call_operand.hbm [shape: f32[32,128], index: 4, kind: input, shape index: {}]   ;;  %s1910_s5 = inlined_call_operand.vmem [shape: f32[1,128], index: 5, kind: input, shape index: {}]   ;;  %s1911_s6 = inlined_call_operand.vmem [shape: f32[1,128], index: 6, kind: input, shape index: {}]   ;;  %s1912_s7 = inlined_call_operand.hbm [shape: f32[64,128], index: 7, kind: input, shape index: {}]   ;;  %s1913_s8 = inlined_call_operand.hbm [shape: f32[1,128], index: 8, kind: input, shape index: {}]   ;;  %s1914_s9 = inlined_call_operand.vmem [shape: f32[64,32], index: 9, kind: input, shape index: {}]   ;;  %s1915_s10 = inlined_call_operand.vmem [shape: f32[1,32], index: 10, kind: input, shape index: {}]   ;;  %s1916_s11 = inlined_call_operand.hbm [shape: f32[8,128], index: 11, kind: output, shape index: {}]  }
   0x1   :  { %17 = vsyncpa [#allocation6], 0 }
   0x2   :  { %18 = vsyncpa [#allocation9], 0 }
   0x3   :  { %19 = vsyncpa [#allocation4], 0  ;;  %s1479_s17 = smov [#allocation5]   ;;  %s1339_s21 = scalar_lea.hbm %s1906_s1, 128 }
   0x4   :  { %s36_s18 = sshll.u32 %s1479_s17, 4  ;;  %p1340_p0 = scmp.ne.s32.totalorder %s1906_s1, %s1339_s21  ;;  %s37_s18 = int_to_ptr.vmem [resolvable:$true] %s36_s18 }
   0x5   :  { %p1343_p1 = scmp.lt.u32.totalorder %s1339_s21, %s1906_s1 }
   0x7   :  { %p1345_p2 = pnand %p1343_p1, %p1340_p0 }
   0x9   :  { %1348 = shalt.err (!%p1345_p2)
}
   0xa   :  { %s1349_s26 = scalar_lea.vmem %s37_s18, 128  ;;  %p1354_p4 = scmp.lt.s32.totalorder %s37_s18, %s37_s18 }
   0xb   :  { %p1350_p3 = scmp.ne.s32.totalorder %s37_s18, %s1349_s26  ;;  %p1355_p5 = scmp.lt.s32.totalorder %s1349_s26, %s1349_s26 }
   0xd   :  { %p1356_p6 = por %p1355_p5, %p1354_p4 }
   0xf   :  { %p1357_p7 = pnand %p1356_p6, %p1350_p3 }
  0x11   :  { %1360 = shalt.err (!%p1357_p7)
}
  0x12   :  { %39 = dma.hbm_to_vmem [thread:$0]  %s1906_s1, 128, %s37_s18, [#allocation6]  }
  0x13   :  { %s1480_s29 = smov [#allocation8]   ;;  %s1481_s12 = smov [#allocation2]  }
  0x14   :  { %s65_s30 = sshll.u32 %s1480_s29, 4  ;;  %s26_s13 = sshll.u32 %s1481_s12, 4  ;;  %s66_s30 = int_to_ptr.vmem [resolvable:$true] %s65_s30  ;;  %s27_s13 = int_to_ptr.vmem [resolvable:$true] %s26_s13 }
  0x15   :  { %s1361_s16 = scalar_lea.hbm %s1912_s7, 1024 }
  0x16   :  { %p1362_p8 = scmp.ne.s32.totalorder %s1912_s7, %s1361_s16  ;;  %p1365_p9 = scmp.lt.u32.totalorder %s1361_s16, %s1912_s7 }
  0x18   :  { %p1367_p10 = pnand %p1365_p9, %p1362_p8 }
  0x1a   :  { %1370 = shalt.err (!%p1367_p10)
}
  0x1b   :  { %s1371_s1 = scalar_lea.vmem %s66_s30, 1024  ;;  %p1376_p12 = scmp.lt.s32.totalorder %s66_s30, %s66_s30 }
  0x1c   :  { %p1372_p11 = scmp.ne.s32.totalorder %s66_s30, %s1371_s1  ;;  %p1377_p13 = scmp.lt.s32.totalorder %s1371_s1, %s1371_s1 }
  0x1e   :  { %p1378_p0 = por %p1377_p13, %p1376_p12 }
  0x20   :  { %p1379_p1 = pnand %p1378_p0, %p1372_p11 }
  0x22   :  { %1382 = shalt.err (!%p1379_p1)
}
  0x23   :  { %s1482_s18 = smov 128   ;;  %s1483_s22 = smov 8  }
  0x24   :  { %71 = dma.hbm_to_vmem [thread:$0]  %s1912_s7, 1024, %s66_s30, [#allocation9], %s1482_s18, %s1482_s18, %s1483_s22  }
  0x25   :  { %s1383_s27 = scalar_lea.hbm %s1905_s0, 128 }
  0x26   :  { %p1384_p2 = scmp.ne.s32.totalorder %s1905_s0, %s1383_s27  ;;  %p1387_p3 = scmp.lt.u32.totalorder %s1383_s27, %s1905_s0 }
  0x28   :  { %p1389_p4 = pnand %p1387_p3, %p1384_p2 }
  0x2a   :  { %1392 = shalt.err (!%p1389_p4)
}
  0x2b   :  { %s1393_s15 = scalar_lea.vmem %s27_s13, 128  ;;  %p1398_p6 = scmp.lt.s32.totalorder %s27_s13, %s27_s13 }
  0x2c   :  { %p1394_p5 = scmp.ne.s32.totalorder %s27_s13, %s1393_s15  ;;  %p1399_p7 = scmp.lt.s32.totalorder %s1393_s15, %s1393_s15 }
  0x2e   :  { %p1400_p8 = por %p1399_p7, %p1398_p6 }
  0x30   :  { %p1401_p9 = pnand %p1400_p8, %p1394_p5 }
  0x32   :  { %1404 = shalt.err (!%p1401_p9)
}
  0x33   :  { %29 = dma.hbm_to_vmem [thread:$0]  %s1905_s0, 128, %s27_s13, [#allocation3]  }
  0x34   :  { %s1484_s16 = smov [#allocation7]   ;;  %s1485_s19 = smov [#allocation10]  }
  0x35   :  { %s49_s17 = sshll.u32 %s1484_s16, 4  ;;  %s78_s20 = sshll.u32 %s1485_s19, 4  ;;  %s50_s17 = int_to_ptr.vmem [resolvable:$true] %s49_s17  ;;  %s79_s20 = int_to_ptr.vmem [resolvable:$true] %s78_s20 }
  0x36   :  { %s1405_s23 = scalar_lea.hbm %s1909_s4, 512 }
  0x37   :  { %p1406_p10 = scmp.ne.s32.totalorder %s1909_s4, %s1405_s23  ;;  %p1409_p11 = scmp.lt.u32.totalorder %s1405_s23, %s1909_s4 }
  0x39   :  { %p1411_p12 = pnand %p1409_p11, %p1406_p10 }
  0x3b   :  { %1414 = shalt.err (!%p1411_p12)
}
  0x3c   :  { %s1415_s0 = scalar_lea.vmem %s50_s17, 512  ;;  %p1420_p0 = scmp.lt.s32.totalorder %s50_s17, %s50_s17 }
  0x3d   :  { %p1416_p13 = scmp.ne.s32.totalorder %s50_s17, %s1415_s0  ;;  %p1421_p1 = scmp.lt.s32.totalorder %s1415_s0, %s1415_s0 }
  0x3f   :  { %p1422_p2 = por %p1421_p1, %p1420_p0 }
  0x41   :  { %p1423_p3 = pnand %p1422_p2, %p1416_p13 }
  0x43   :  { %1426 = shalt.err (!%p1423_p3)
}
  0x44   :  { %55 = dma.hbm_to_vmem [thread:$0]  %s1909_s4, 512, %s50_s17, [#allocation6], %s1482_s18, %s1482_s18, %s1483_s22  }
  0x45   :  { %s1427_s14 = scalar_lea.hbm %s1913_s8, 16 }
  0x46   :  { %p1428_p4 = scmp.ne.s32.totalorder %s1913_s8, %s1427_s14  ;;  %p1431_p5 = scmp.lt.u32.totalorder %s1427_s14, %s1913_s8 }
  0x48   :  { %p1433_p6 = pnand %p1431_p5, %p1428_p4 }
  0x4a   :  { %1436 = shalt.err (!%p1433_p6)
}
  0x4b   :  { %s1437_s19 = scalar_lea.vmem %s79_s20, 16  ;;  %s1441_s21 = scalar_lea.vmem %s79_s20, 32 }
  0x4c   :  { %p1438_p7 = scmp.ne.s32.totalorder %s79_s20, %s1437_s19  ;;  %p1442_p8 = scmp.lt.s32.totalorder %s79_s20, %s79_s20 }
  0x4d   :  { %p1443_p9 = scmp.lt.s32.totalorder %s1441_s21, %s1437_s19 }
  0x4f   :  { %p1444_p10 = por %p1443_p9, %p1442_p8 }
  0x51   :  { %p1445_p11 = pnand %p1444_p10, %p1438_p7 }
  0x53   :  { %1448 = shalt.err (!%p1445_p11)
}
  0x54   :  { %81 = dma.hbm_to_vmem [thread:$0]  %s1913_s8, 16, %s79_s20, [#allocation9]  }
  0x55   :  { %1471 = dma.done.wait [#allocation3], 128  }
  0x56   :  { %1472 = vsyncadd [#allocation3], 4294967168 }
  0x57   :  { %1473 = dma.done.wait [#allocation6], 640  }
  0x58   :  { %1474 = vsyncadd [#allocation6], 4294966656 }
  0x59   :  { %1475 = dma.done.wait [#allocation9], 1040  }
  0x5a   :  { %1476 = vsyncadd [#allocation9], 4294966256  ;;  %v1486_v0 = vmov 0.0|0.0   ;;  %vm1487_vm0 = vmmov 0   ;;  %v1488_v1 = vmov 0.0   ;;  %v111_v2 = vld [vmem:[%s1908_s3] sm:$0xff]  ;;  %v334_v25 = vlaneseq }
  0x5b   :  { %1242 = vmatprep.subr.bf16.mxu0 %v1486_v0  ;;  %1181 = vmatprep.mubr.msk.f32.mxu0 %vm1487_vm0, %v1488_v1  ;;  %v112_v3 = vld [vmem:[%s1908_s3 + $0x8] sm:$0xff]  ;;  %v196_v4 = vld [vmem:[#allocation7] sm:$0xff]  ;;  %v197_v6 = vld [vmem:[#allocation7 + $0x8] sm:$0xff]  ;;  %vm122_vm1 = vcmask 261120   ;;  %v1489_v23 = vmov 1966171168  }
  0x5c   :  { %v1243_v5 = vpack.c.bf16 %v112_v3, %v111_v2  ;;  %v113_v7 = vld [vmem:[%s1908_s3 + $0x10] sm:$0xff]  ;;  %v114_v8 = vld [vmem:[%s1908_s3 + $0x18] sm:$0xff]  ;;  %v1248_v9 = vpack.c.bf16 %v197_v6, %v196_v4  ;;  %v198_v10 = vld [vmem:[#allocation7 + $0x10] sm:$0xff]  ;;  %v332_v24 = vunpack.c.l.s4 %v1489_v23  ;;  %v1700_v27 = vshrl.u32 %v334_v25, 7  ;;  %s1492_s17 = smov 64   ;;  %s1493_s30 = smov [#allocation11]  }
  0x5d   :  { %v199_v11 = vld [vmem:[#allocation7 + $0x18] sm:$0xff]  ;;  %v1246_v12 = vpack.c.bf16 %v114_v8, %v113_v7  ;;  %v1637_v14 = vld [vmem:[%s1907_s2] sm:$0xff]  ;;  %v1655_v17 = vld [vmem:[%s1907_s2 + $0x10] sm:$0xff]  ;;  %vm508_vm2 = vcmask 1041409   ;;  %vm510_vm3 = vcmask 1042434   ;;  %vm512_vm4 = vcmask 1043459  }
  0x5e   :  { %1244 = vmatpush3.bf16.msra.mxu0 %v1243_v5  ;;  %v1252_v13 = vpack.c.bf16 %v199_v11, %v198_v10  ;;  %1249 = vmatprep.subr.bf16.mxu1 %v1248_v9  ;;  %v1642_v15 = vld [vmem:[#allocation2] sm:$0xff]  ;;  %v1648_v16 = vld [vmem:[%s1907_s2 + $0x8] sm:$0xff]  ;;  %v1666_v18 = vld [vmem:[%s1907_s2 + $0x18] sm:$0xff]  ;;  %v333_v26 = vunpack.c.0.s8 %v332_v24  ;;  %v1707_v36 = vsub.s32 0, %v1700_v27  ;;  %vm514_vm5 = vcmask 1044484   ;;  %s1111_s16 = sshll.u32 %s1493_s30, 4  ;;  %s1112_s16 = int_to_ptr.vmem [resolvable:$true] %s1111_s16 }
  0x5f   :  { %1245 = vmatprep.subr.bf16.mxu0 %v1486_v0  ;;  %1251 = vmatpush3.bf16.msra.mxu1 %v1248_v9  ;;  %v1671_v19 = vld [vmem:[%s1907_s2 + $0x20] sm:$0xff]  ;;  %v1680_v20 = vld [vmem:[%s1907_s2 + $0x28] sm:$0xff]  ;;  %v1685_v21 = vld [vmem:[%s1907_s2 + $0x30] sm:$0xff]  ;;  %vm516_vm6 = vcmask 1045509   ;;  %vm518_vm7 = vcmask 1046534   ;;  %vm520_vm8 = vcmask 1047559   ;;  %p1454_p13 = scmp.lt.s32.totalorder %s1112_s16, %s1112_s16 }
  0x60   :  { %1192 = vmatprep.mubr.msk.f32.mxu1 %vm122_vm1, %v1637_v14  ;;  %1253 = vmatprep.subr.bf16.mxu1 %v1252_v13  ;;  %v1694_v22 = vld [vmem:[%s1907_s2 + $0x38] sm:$0xff]  ;;  %v1122_v28 = vld [vmem:[%s1910_s5] ss:$0 sm:$0xff]  ;;  %v336_v29 = vsub.s32 %v333_v26, %v1700_v27  ;;  %vm523_vm9 = vcmask 64512   ;;  %vm855_vm10 = vcmask 523264   ;;  %vm1100_vm11 = vcmask 785408  }
  0x61   :  { %v1132_v8 = vld [vmem:[%s1911_s6] ss:$0 sm:$0xff]  ;;  %s1491_s6 = smov 32   ;;  %vm1102_vm12 = vcmask 850944  }
  0x62   :  { %1247 = vmatpush3.bf16.msra.mxu0 %v1246_v12 }
  0x63   :  { %1256 = vmatprep.subr.bf16.mxu0 %v1486_v0  ;;  %1255 = vmatpush3.bf16.msra.mxu1 %v1252_v13 }
  0x64   :  { %1268 = vmatprep.subr.bf16.mxu1 %v1486_v0 }
  0x65   :  { %1182 = vmatmul.mubr.msk.f32.vlgmr.msra.gmra.mrb[0].mxu0 %vm122_vm1, %v1642_v15 }
  0x66   :  { %1220 = vmatprep.mubr.msk.f32.mxu0 %vm1487_vm0, %v1488_v1  ;;  %1193 = vmatmul.mubr.msk.f32.vlgmr.msra.gmra.mrb[0].mxu1 %vm122_vm1, %v1648_v16 }
  0x67   :  { %1195 = vmatprep.mubr.msk.f32.mxu1 %vm122_vm1, %v1655_v17 }
  0x6a   :  { %1196 = vmatmul.mubr.msk.f32.gmra.mrb[2].mxu1 %vm122_vm1, %v1666_v18 }
  0x6b   :  { %1198 = vmatprep.mubr.msk.f32.mxu1 %vm122_vm1, %v1671_v19 }
  0x6e   :  { %1199 = vmatmul.mubr.msk.f32.gmra.mrb[4].mxu1 %vm122_vm1, %v1680_v20 }
  0x6f   :  { %1201 = vmatprep.mubr.msk.f32.mxu1 %vm122_vm1, %v1685_v21 }
  0x72   :  { %1202 = vmatmul.mubr.msk.f32.gmra.mrb[6].mxu1 %vm122_vm1, %v1694_v22 }
  0x73   :  { %1239 = vmatprep.mubr.msk.f32.mxu1 %vm1487_vm0, %v1488_v1 }
 0x138   :  { %v192_v30 = vpop.f32.mrb[0].mxu0 }
 0x139   :  { %v193_v31 = vadd.f32 %v1122_v28, %v192_v30  ;;  %v1183_v32 = vpop.f32.mrb[1].mxu0  ;;  %v1194_v33 = vpop.f32.mrb[0].mxu1 }
 0x13a   :  { %v290_v37 = vpop.f32.mrb[1].mxu1 }
 0x13b   :  { %v330_v34 = vcombine.high %v193_v31, %v193_v31  ;;  %v337_v35 = vrot.slane %v193_v31, %v336_v29 }
 0x13d   :  { %v344_v38 = vrot.slane %v330_v34, %v336_v29  ;;  %v345_v39 = vcombine.high %v337_v35, %v337_v35  ;;  %v353_v40 = vrot.slane %v337_v35, %v336_v29  ;;  %v1197_v41 = vpop.f32.mrb[2].mxu1 }
 0x13e   :  { %v300_v44 = vpop.f32.mrb[3].mxu1 }
 0x13f   :  { %v367_v42 = vrot.slane %v345_v39, %v336_v29  ;;  %v382_v43 = vrot.slane %v353_v40, %v1707_v36  ;;  %v375_v45 = vcombine.high %v353_v40, %v353_v40  ;;  %v346_v46 = vcombine.high %v344_v38, %v344_v38 }
 0x140   :  { %v360_v47 = vrot.slane %v344_v38, %v336_v29 }
 0x141   :  { %v386_v48 = vrot.slane %v367_v42, %v1707_v36  ;;  %v419_v49 = vadd.f32 %v382_v43, %v290_v37  ;;  %v377_v50 = vcombine.high %v367_v42, %v367_v42  ;;  %v390_v51 = vrot.slane %v375_v45, %v1707_v36  ;;  %v1200_v52 = vpop.f32.mrb[4].mxu1 }
 0x142   :  { %v374_v53 = vrot.slane %v346_v46, %v336_v29  ;;  %v398_v54 = vrot.slane %v360_v47, %v1707_v36  ;;  %v376_v55 = vcombine.high %v360_v47, %v360_v47  ;;  %v310_v59 = vpop.f32.mrb[5].mxu1  ;;  %v1721_v37 = vand.u32 127, %v334_v25 }
 0x143   :  { %v420_v56 = vadd.f32 %v1194_v33, %v386_v48  ;;  %1297 = vtanh.f32 %v419_v49  ;;  %v394_v57 = vrot.slane %v377_v50, %v1707_v36  ;;  %v421_v58 = vadd.f32 %v390_v51, %v300_v44 }
 0x144   :  { %v402_v60 = vrot.slane %v374_v53, %v1707_v36  ;;  %v423_v61 = vadd.f32 %v398_v54, %v310_v59  ;;  %v378_v62 = vcombine.high %v374_v53, %v374_v53  ;;  %v406_v4 = vrot.slane %v376_v55, %v1707_v36 }
 0x145   :  { %1299 = vtanh.f32 %v420_v56  ;;  %v422_v63 = vadd.f32 %v1197_v41, %v394_v57  ;;  %v1203_v2 = vpop.f32.mrb[6].mxu1  ;;  %v1725_v39 = vsub.s32 %v1721_v37, %v1700_v27 }
 0x146   :  { %1301 = vtanh.f32 %v421_v58  ;;  %v424_v1 = vadd.f32 %v1200_v52, %v402_v60  ;;  %v410_v3 = vrot.slane %v378_v62, %v1707_v36  ;;  %v320_v5 = vpop.f32.mrb[7].mxu1  ;;  %v1490_v62 = vmov 0  }
 0x147   :  { %1303 = vtanh.f32 %v422_v63  ;;  %v425_v7 = vadd.f32 %v406_v4, %v320_v5  ;;  %1296 = vset.pattern.permute.xlu0 %v1490_v62  ;;  %1295 = vset.pattern.permute.xlu1 %v1490_v62  ;;  %v534_v63 = vsub.s32 1, %v1700_v27 }
 0x148   :  { %v426_v6 = vadd.f32 %v1203_v2, %v410_v3  ;;  %1305 = vtanh.f32 %v423_v61  ;;  %v542_v2 = vsub.s32 3, %v1700_v27 }
 0x149   :  { %1307 = vtanh.f32 %v424_v1  ;;  %v538_v1 = vsub.s32 2, %v1700_v27 }
 0x14a   :  { %1309 = vtanh.f32 %v425_v7  ;;  %v546_v7 = vsub.s32 4, %v1700_v27 }
 0x14b   :  { %1311 = vtanh.f32 %v426_v6 }
 0x14d   :  { %v1298_v9 = vpop.eup %1297 }
 0x14e   :  { %v442_v10 = vmul.f32 %v1298_v9, %v1132_v8 }
 0x14f   :  { %v1300_v11 = vpop.eup %1299 }
 0x150   :  { %v1302_v12 = vpop.eup %1301  ;;  %450 = vadd.xlane.f32.xlu0 %v442_v10  ;;  %v443_v24 = vmul.f32 %v1300_v11, %v1132_v8 }
 0x151   :  { %v444_v13 = vmul.f32 %v1302_v12, %v1132_v8  ;;  %v1304_v23 = vpop.eup %1303 }
 0x152   :  { %v1306_v26 = vpop.eup %1305  ;;  %v445_v28 = vmul.f32 %v1304_v23, %v1132_v8  ;;  %v550_v23 = vsub.s32 5, %v1700_v27 }
 0x153   :  { %454 = vadd.xlane.f32.xlu1 %v444_v13  ;;  %v1308_v29 = vpop.eup %1307  ;;  %v446_v30 = vmul.f32 %v1306_v26, %v1132_v8 }
 0x154   :  { %452 = vadd.xlane.f32.xlu0 %v443_v24  ;;  %v1310_v31 = vpop.eup %1309  ;;  %v447_v32 = vmul.f32 %v1308_v29, %v1132_v8  ;;  %v554_v29 = vsub.s32 6, %v1700_v27 }
 0x155   :  { %v1312_v33 = vpop.eup %1311  ;;  %v448_v34 = vmul.f32 %v1310_v31, %v1132_v8 }
 0x156   :  { %v449_v35 = vmul.f32 %v1312_v33, %v1132_v8  ;;  %v558_v33 = vsub.s32 7, %v1700_v27 }
 0x157   :  { %456 = vadd.xlane.f32.xlu1 %v445_v28 }
 0x158   :  { %458 = vadd.xlane.f32.xlu0 %v446_v30 }
 0x15b   :  { %460 = vadd.xlane.f32.xlu1 %v447_v32 }
 0x15c   :  { %462 = vadd.xlane.f32.xlu0 %v448_v34 }
 0x15f   :  { %464 = vadd.xlane.f32.xlu1 %v449_v35 }
 0x1dd   :  { %v451_v38 = vpop.xlane.xlu0 %450 }
 0x1de   :  { %v479_v42 = vrot.slane %v451_v38, %v1725_v39 }
 0x1e0   :  { %v455_v40 = vpop.xlane.xlu1 %454 }
 0x1e1   :  { %v453_v41 = vpop.xlane.xlu0 %452  ;;  %v487_v44 = vrot.slane %v455_v40, %v1725_v39 }
 0x1e2   :  { %v483_v43 = vrot.slane %v453_v41, %v1725_v39 }
 0x1e4   :  { %v509_v45 = vsel %vm508_vm2, %v483_v43, %v479_v42  ;;  %v457_v25 = vpop.xlane.xlu1 %456 }
 0x1e5   :  { %v511_v46 = vsel %vm510_vm3, %v487_v44, %v509_v45  ;;  %v491_v47 = vrot.slane %v457_v25, %v1725_v39  ;;  %v459_v48 = vpop.xlane.xlu0 %458 }
 0x1e6   :  { %v495_v49 = vrot.slane %v459_v48, %v1725_v39 }
 0x1e7   :  { %v513_v50 = vsel %vm512_vm4, %v491_v47, %v511_v46 }
 0x1e8   :  { %v515_v51 = vsel %vm514_vm5, %v495_v49, %v513_v50  ;;  %v461_v52 = vpop.xlane.xlu1 %460 }
 0x1e9   :  { %v499_v53 = vrot.slane %v461_v52, %v1725_v39  ;;  %v463_v54 = vpop.xlane.xlu0 %462 }
 0x1ea   :  { %v503_v55 = vrot.slane %v463_v54, %v1725_v39 }
 0x1eb   :  { %v517_v56 = vsel %vm516_vm6, %v499_v53, %v515_v51 }
 0x1ec   :  { %v465_v57 = vpop.xlane.xlu1 %464  ;;  %v519_v58 = vsel %vm518_vm7, %v503_v55, %v517_v56 }
 0x1ed   :  { %v507_v59 = vrot.slane %v465_v57, %v1725_v39 }
 0x1ef   :  { %v521_v60 = vsel %vm520_vm8, %v507_v59, %v519_v58 }
 0x1f0   :  { %v524_v61 = vsel %vm523_vm9, %v521_v60, -inf }
 0x1f1   :  { %525 = vmax.xlane.f32.xlu0 %v524_v61 }
 0x27e   :  { %v526_v3 = vpop.xlane.xlu0 %525 }
 0x27f   :  { %v531_v4 = vrot.slane %v526_v3, %v1707_v36  ;;  %v535_v5 = vrot.slane %v526_v3, %v534_v63  ;;  %v539_v6 = vrot.slane %v526_v3, %v538_v1  ;;  %v543_v8 = vrot.slane %v526_v3, %v542_v2 }
 0x280   :  { %v547_v24 = vrot.slane %v526_v3, %v546_v7  ;;  %v551_v30 = vrot.slane %v526_v3, %v550_v23  ;;  %v555_v34 = vrot.slane %v526_v3, %v554_v29  ;;  %v559_v42 = vrot.slane %v526_v3, %v558_v33 }
 0x281   :  { %v568_v9 = vsub.f32 %v451_v38, %v531_v4  ;;  %v569_v10 = vsub.f32 %v453_v41, %v535_v5  ;;  %v570_v11 = vsub.f32 %v455_v40, %v539_v6  ;;  %v571_v26 = vsub.f32 %v457_v25, %v543_v8 }
 0x282   :  { %v572_v31 = vsub.f32 %v459_v48, %v547_v24  ;;  %v573_v35 = vsub.f32 %v461_v52, %v551_v30  ;;  %v574_v43 = vsub.f32 %v463_v54, %v555_v34  ;;  %v575_v25 = vsub.f32 %v465_v57, %v559_v42 }
 0x283   :  { %v576_v12 = vmul.f32 1.442695, %v568_v9  ;;  %v578_v13 = vmul.f32 1.442695, %v569_v10  ;;  %v580_v28 = vmul.f32 1.442695, %v570_v11 }
 0x284   :  { %v582_v32 = vmul.f32 1.442695, %v571_v26  ;;  %v584_v38 = vmul.f32 1.442695, %v572_v31  ;;  %v586_v44 = vmul.f32 1.442695, %v573_v35 }
 0x285   :  { %1313 = vpow2.f32 %v576_v12  ;;  %v588_v46 = vmul.f32 1.442695, %v574_v43  ;;  %v590_v48 = vmul.f32 1.442695, %v575_v25 }
 0x286   :  { %1315 = vpow2.f32 %v578_v13 }
 0x287   :  { %1317 = vpow2.f32 %v580_v28 }
 0x288   :  { %1319 = vpow2.f32 %v582_v32 }
 0x289   :  { %1321 = vpow2.f32 %v584_v38 }
 0x28a   :  { %1323 = vpow2.f32 %v586_v44 }
 0x28b   :  { %1325 = vpow2.f32 %v588_v46 }
 0x28c   :  { %1327 = vpow2.f32 %v590_v48  ;;  %v842_v48 = vld [vmem:[#allocation8 + $0x10] sm:$0xff] }
 0x28f   :  { %v1314_v40 = vpop.eup %1313 }
 0x290   :  { %v1316_v41 = vpop.eup %1315  ;;  %601 = vperm.xlu1 %1295, %v1314_v40  }
 0x291   :  { %604 = vperm.xlu0 %1296, %v1316_v41   ;;  %v1318_v45 = vpop.eup %1317 }
 0x292   :  { %v1320_v47 = vpop.eup %1319 }
 0x293   :  { %v1322_v49 = vpop.eup %1321 }
 0x294   :  { %607 = vperm.xlu1 %1295, %v1318_v45   ;;  %v1324_v50 = vpop.eup %1323 }
 0x295   :  { %v1326_v51 = vpop.eup %1325 }
 0x296   :  { %v1328_v52 = vpop.eup %1327 }
 0x298   :  { %610 = vperm.xlu1 %1295, %v1320_v47  }
 0x29c   :  { %613 = vperm.xlu1 %1295, %v1322_v49  }
 0x2a0   :  { %616 = vperm.xlu1 %1295, %v1324_v50  }
 0x2a4   :  { %619 = vperm.xlu1 %1295, %v1326_v51  }
 0x2a8   :  { %622 = vperm.xlu1 %1295, %v1328_v52  }
 0x30f   :  { %v602_v53 = vpop.permute.xlu1 %601 }
 0x310   :  { %v605_v57 = vpop.permute.xlu0 %604  ;;  %v627_v60 = vrot.slane %v602_v53, %v1725_v39  ;;  %v843_v53 = vld [vmem:[#allocation8 + $0x18] sm:$0xff] }
 0x311   :  { %v631_v59 = vrot.slane %v605_v57, %v1725_v39 }
 0x313   :  { %v608_v54 = vpop.permute.xlu1 %607  ;;  %v656_v5 = vsel %vm508_vm2, %v631_v59, %v627_v60 }
 0x314   :  { %v635_v61 = vrot.slane %v608_v54, %v1725_v39  ;;  %v845_v54 = vld [vmem:[#allocation8 + $0x28] sm:$0xff] }
 0x316   :  { %v657_v8 = vsel %vm510_vm3, %v635_v61, %v656_v5 }
 0x317   :  { %v611_v55 = vpop.permute.xlu1 %610 }
 0x318   :  { %v639_v62 = vrot.slane %v611_v55, %v1725_v39  ;;  %v1057_v55 = vadd.s32 4294967200, %v1721_v37 }
 0x31a   :  { %v658_v10 = vsel %vm512_vm4, %v639_v62, %v657_v8  ;;  %v1801_v57 = vsub.s32 %v1057_v55, %v1700_v27 }
 0x31b   :  { %v614_v56 = vpop.permute.xlu1 %613 }
 0x31c   :  { %v643_v3 = vrot.slane %v614_v56, %v1725_v39 }
 0x31e   :  { %v659_v11 = vsel %vm514_vm5, %v643_v3, %v658_v10 }
 0x31f   :  { %v617_v58 = vpop.permute.xlu1 %616 }
 0x320   :  { %v647_v6 = vrot.slane %v617_v58, %v1725_v39 }
 0x322   :  { %v660_v13 = vsel %vm516_vm6, %v647_v6, %v659_v11 }
 0x323   :  { %v620_v4 = vpop.permute.xlu1 %619 }
 0x324   :  { %v651_v9 = vrot.slane %v620_v4, %v1725_v39 }
 0x326   :  { %v661_v26 = vsel %vm518_vm7, %v651_v9, %v660_v13 }
 0x327   :  { %v623_v12 = vpop.permute.xlu1 %622 }
 0x328   :  { %v655_v24 = vrot.slane %v623_v12, %v1725_v39 }
 0x32a   :  { %v662_v28 = vsel %vm520_vm8, %v655_v24, %v661_v26 }
 0x32b   :  { %v664_v30 = vsel %vm523_vm9, %v662_v28, 0.0 }
 0x32c   :  { %665 = vadd.xlane.f32.xlu1 %v664_v30 }
 0x3b9   :  { %v666_v31 = vpop.xlane.xlu1 %665 }
 0x3ba   :  { %1329 = vrcp.f32 %v666_v31 }
 0x3c4   :  { %v1330_v32 = vpop.eup %1329 }
 0x3c5   :  { %v672_v34 = vrot.slane %v1330_v32, %v1707_v36  ;;  %v676_v38 = vrot.slane %v1330_v32, %v534_v63  ;;  %v680_v39 = vrot.slane %v1330_v32, %v538_v1  ;;  %v684_v44 = vrot.slane %v1330_v32, %v542_v2 }
 0x3c6   :  { %v688_v46 = vrot.slane %v1330_v32, %v546_v7  ;;  %v692_v63 = vrot.slane %v1330_v32, %v550_v23  ;;  %v696_v1 = vrot.slane %v1330_v32, %v554_v29  ;;  %v700_v2 = vrot.slane %v1330_v32, %v558_v33  ;;  %v841_v7 = vld [vmem:[#allocation8 + $0x8] sm:$0xff]  ;;  %v847_v33 = vld [vmem:[#allocation8 + $0x38] sm:$0xff] }
 0x3c7   :  { %v709_v35 = vmul.f32 %v1314_v40, %v672_v34  ;;  %v710_v42 = vmul.f32 %v1316_v41, %v676_v38  ;;  %v711_v43 = vmul.f32 %v1318_v45, %v680_v39  ;;  %v712_v25 = vmul.f32 %v1320_v47, %v684_v44  ;;  %v840_v47 = vld [vmem:[#allocation8] sm:$0xff] }
 0x3c8   :  { %v713_v36 = vmul.f32 %v1322_v49, %v688_v46  ;;  %v714_v40 = vmul.f32 %v1324_v50, %v692_v63  ;;  %v715_v41 = vmul.f32 %v1326_v51, %v696_v1  ;;  %v716_v45 = vmul.f32 %v1328_v52, %v700_v2  ;;  %v844_v50 = vld [vmem:[#allocation8 + $0x20] sm:$0xff]  ;;  %v846_v51 = vld [vmem:[#allocation8 + $0x30] sm:$0xff] }
 0x3c9   :  { %719 = vperm.xlu0 %1296, %v709_v35   ;;  %v1257_v49 = vpack.c.bf16 %v841_v7, %v840_v47  ;;  %v1260_v23 = vpack.c.bf16 %v843_v53, %v842_v48  ;;  %v1263_v29 = vpack.c.bf16 %v845_v54, %v844_v50  ;;  %v1266_v52 = vpack.c.bf16 %v847_v33, %v846_v51 }
 0x3cb   :  { %1258 = vmatpush3.bf16.msra.mxu0 %v1257_v49 }
 0x3cc   :  { %1259 = vmatprep.subr.bf16.mxu0 %v1486_v0 }
 0x3cd   :  { %724 = vperm.xlu0 %1296, %v710_v42  }
 0x3cf   :  { %1261 = vmatpush3.bf16.msra.mxu0 %v1260_v23 }
 0x3d0   :  { %1262 = vmatprep.subr.bf16.mxu0 %v1486_v0 }
 0x3d1   :  { %729 = vperm.xlu0 %1296, %v711_v43  }
 0x3d3   :  { %1264 = vmatpush3.bf16.msra.mxu0 %v1263_v29 }
 0x3d4   :  { %1265 = vmatprep.subr.bf16.mxu0 %v1486_v0 }
 0x3d5   :  { %734 = vperm.xlu0 %1296, %v712_v25  }
 0x3d7   :  { %1267 = vmatpush3.bf16.msra.mxu0 %v1266_v52 }
 0x3d9   :  { %739 = vperm.xlu0 %1296, %v713_v36  }
 0x3dd   :  { %744 = vperm.xlu0 %1296, %v714_v40  }
 0x3e1   :  { %749 = vperm.xlu0 %1296, %v715_v41  }
 0x3e5   :  { %754 = vperm.xlu0 %1296, %v716_v45  }
 0x448   :  { %v720_v56 = vpop.permute.xlu0 %719 }
 0x449   :  { %v1061_v59 = vrot.slane %v720_v56, %v1801_v57  ;;  %v757_v4 = vmul.f32 %v720_v56, %v1637_v14 }
 0x44b   :  { %v765_v10 = vsel %vm122_vm1, %v757_v4, 0.0 }
 0x44c   :  { %v725_v58 = vpop.permute.xlu0 %724  ;;  %v766_v24 = vrot.slane %v765_v10, 4 }
 0x44d   :  { %v1065_v60 = vrot.slane %v725_v58, %v1801_v57  ;;  %v758_v61 = vmul.f32 %v725_v58, %v1648_v16 }
 0x44e   :  { %v767_v38 = vadd.f32 %v766_v24, %v765_v10 }
 0x44f   :  { %v1090_v62 = vsel %vm508_vm2, %v1065_v60, %v1061_v59  ;;  %v772_v6 = vsel %vm122_vm1, %v758_v61, 0.0 }
 0x450   :  { %v730_v3 = vpop.permute.xlu0 %729  ;;  %v773_v12 = vrot.slane %v772_v6, 4  ;;  %v768_v1 = vrot.slane %v767_v38, 2 }
 0x451   :  { %v759_v5 = vmul.f32 %v730_v3, %v1655_v17  ;;  %v1069_v37 = vrot.slane %v730_v3, %v1801_v57 }
 0x452   :  { %v774_v32 = vadd.f32 %v773_v12, %v772_v6  ;;  %v769_v54 = vadd.f32 %v768_v1, %v767_v38 }
 0x453   :  { %v1091_v27 = vsel %vm510_vm3, %v1069_v37, %v1090_v62  ;;  %v779_v8 = vsel %vm122_vm1, %v759_v5, 0.0 }
 0x454   :  { %v735_v9 = vpop.permute.xlu0 %734  ;;  %v780_v13 = vrot.slane %v779_v8, 4  ;;  %v775_v46 = vrot.slane %v774_v32, 2  ;;  %v770_v62 = vrot.slane %v769_v54, 1 }
 0x455   :  { %v760_v16 = vmul.f32 %v735_v9, %v1666_v18  ;;  %v1073_v11 = vrot.slane %v735_v9, %v1801_v57 }
 0x456   :  { %v781_v34 = vadd.f32 %v780_v13, %v779_v8  ;;  %v776_v49 = vadd.f32 %v775_v46, %v774_v32 }
 0x457   :  { %v786_v14 = vsel %vm122_vm1, %v760_v16, 0.0  ;;  %v1092_v17 = vsel %vm512_vm4, %v1073_v11, %v1091_v27  ;;  %v771_v16 = vadd.f32 %v770_v62, %v769_v54  ;;  %v965_v54 = vld [vmem:[%s1914_s9 + $0x18] sm:$0xff] }
 0x458   :  { %v787_v26 = vrot.slane %v786_v14, 4  ;;  %v740_v28 = vpop.permute.xlu0 %739  ;;  %v782_v63 = vrot.slane %v781_v34, 2  ;;  %v777_v56 = vrot.slane %v776_v49, 1 }
 0x459   :  { %v761_v30 = vmul.f32 %v740_v28, %v1671_v19  ;;  %v1077_v31 = vrot.slane %v740_v28, %v1801_v57 }
 0x45a   :  { %v788_v42 = vadd.f32 %v787_v26, %v786_v14  ;;  %v783_v53 = vadd.f32 %v782_v63, %v781_v34  ;;  %v778_v6 = vadd.f32 %v777_v56, %v776_v49  ;;  %v102_v63 = vld [vmem:[#allocation5] sm:$0xff]  ;;  %v962_v49 = vld [vmem:[%s1914_s9] sm:$0xff]  ;;  %v968_v56 = vld [vmem:[%s1914_s9 + $0x30] sm:$0xff] }
 0x45b   :  { %v793_v35 = vsel %vm122_vm1, %v761_v30, 0.0  ;;  %v1093_v18 = vsel %vm514_vm5, %v1077_v31, %v1092_v17 }
 0x45c   :  { %v794_v39 = vrot.slane %v793_v35, 4  ;;  %v745_v43 = vpop.permute.xlu0 %744  ;;  %v789_v41 = vrot.slane %v788_v42, 2  ;;  %v784_v60 = vrot.slane %v783_v53, 1  ;;  %v829_v14 = vsel %vm508_vm2, %v778_v6, %v771_v16 }
 0x45d   :  { %v762_v44 = vmul.f32 %v745_v43, %v1680_v20  ;;  %v1081_v25 = vrot.slane %v745_v43, %v1801_v57  ;;  %v1133_v43 = vld [vmem:[#allocation10] ss:$0 sm:$0xff] }
 0x45e   :  { %v795_v36 = vadd.f32 %v794_v39, %v793_v35  ;;  %v790_v29 = vadd.f32 %v789_v41, %v788_v42  ;;  %v785_v10 = vadd.f32 %v784_v60, %v783_v53  ;;  %v964_v53 = vld [vmem:[%s1914_s9 + $0x10] sm:$0xff] }
 0x45f   :  { %v800_v19 = vsel %vm122_vm1, %v762_v44, 0.0  ;;  %v1094_v40 = vsel %vm516_vm6, %v1081_v25, %v1093_v18 }
 0x460   :  { %v801_v2 = vrot.slane %v800_v19, 4  ;;  %v750_v45 = vpop.permute.xlu0 %749  ;;  %v796_v47 = vrot.slane %v795_v36, 2  ;;  %v791_v3 = vrot.slane %v790_v29, 1  ;;  %v830_v28 = vsel %vm510_vm3, %v785_v10, %v829_v14 }
 0x461   :  { %v763_v7 = vmul.f32 %v750_v45, %v1685_v21  ;;  %v1085_v48 = vrot.slane %v750_v45, %v1801_v57 }
 0x462   :  { %v802_v20 = vadd.f32 %v801_v2, %v800_v19  ;;  %v797_v55 = vadd.f32 %v796_v47, %v795_v36  ;;  %v792_v11 = vadd.f32 %v791_v3, %v790_v29  ;;  %v1272_v29 = vpack.c.bf16 %v965_v54, %v964_v53 }
 0x463   :  { %v807_v23 = vsel %vm122_vm1, %v763_v7, 0.0  ;;  %v1830_v50 = vsel %vm518_vm7, %v1085_v48, %v1094_v40 }
 0x464   :  { %v803_v51 = vrot.slane %v802_v20, 2  ;;  %v808_v33 = vrot.slane %v807_v23, 4  ;;  %v1832_v52 = vpop.permute.xlu0 %754  ;;  %v798_v37 = vrot.slane %v797_v55, 1  ;;  %v831_v31 = vsel %vm512_vm4, %v792_v11, %v830_v28 }
 0x465   :  { %v764_v21 = vmul.f32 %v1832_v52, %v1694_v22 }
 0x466   :  { %v804_v58 = vadd.f32 %v803_v51, %v802_v20  ;;  %v809_v59 = vadd.f32 %v808_v33, %v807_v23  ;;  %v799_v13 = vadd.f32 %v798_v37, %v797_v55  ;;  %v963_v20 = vld [vmem:[%s1914_s9 + $0x8] sm:$0xff]  ;;  %v966_v51 = vld [vmem:[%s1914_s9 + $0x20] sm:$0xff] }
 0x467   :  { %v814_v61 = vsel %vm122_vm1, %v764_v21, 0.0  ;;  %v1269_v23 = vpack.c.bf16 %v963_v20, %v962_v49  ;;  %v967_v33 = vld [vmem:[%s1914_s9 + $0x28] sm:$0xff] }
 0x468   :  { %v810_v4 = vrot.slane %v809_v59, 2  ;;  %v815_v5 = vrot.slane %v814_v61, 4  ;;  %v805_v27 = vrot.slane %v804_v58, 1  ;;  %v832_v32 = vsel %vm514_vm5, %v799_v13, %v831_v31 }
 0x469   :  { %1270 = vmatpush3.bf16.msra.mxu1 %v1269_v23  ;;  %v1275_v21 = vpack.c.bf16 %v967_v33, %v966_v51 }
 0x46a   :  { %v811_v8 = vadd.f32 %v810_v4, %v809_v59  ;;  %v816_v9 = vadd.f32 %v815_v5, %v814_v61  ;;  %v806_v17 = vadd.f32 %v805_v27, %v804_v58  ;;  %1271 = vmatprep.subr.bf16.mxu1 %v1486_v0  ;;  %v969_v58 = vld [vmem:[%s1914_s9 + $0x38] sm:$0xff]  ;;  %v1136_v4 = vld [vmem:[%s1915_s10] ss:$0 sm:$0xff]  ;;  %s1449_s10 = scalar_lea.vmem %s1112_s16, 128 }
 0x46b   :  { %v1278_v59 = vpack.c.bf16 %v969_v58, %v968_v56  ;;  %p1450_p12 = scmp.ne.s32.totalorder %s1112_s16, %s1449_s10  ;;  %p1455_p0 = scmp.lt.s32.totalorder %s1449_s10, %s1449_s10 }
 0x46c   :  { %v812_v12 = vrot.slane %v811_v8, 1  ;;  %v817_v22 = vrot.slane %v816_v9, 2  ;;  %v833_v35 = vsel %vm516_vm6, %v806_v17, %v832_v32 }
 0x46d   :  { %1273 = vmatpush3.bf16.msra.mxu1 %v1272_v29  ;;  %p1456_p1 = por %p1455_p0, %p1454_p13 }
 0x46e   :  { %v818_v24 = vadd.f32 %v817_v22, %v816_v9  ;;  %v813_v26 = vadd.f32 %v812_v12, %v811_v8  ;;  %1274 = vmatprep.subr.bf16.mxu1 %v1486_v0 }
 0x46f   :  { %p1457_p2 = pnand %p1456_p1, %p1450_p12 }
 0x470   :  { %v819_v30 = vrot.slane %v818_v24, 1  ;;  %v834_v18 = vsel %vm518_vm7, %v813_v26, %v833_v35 }
 0x471   :  { %1276 = vmatpush3.bf16.msra.mxu1 %v1275_v21 }
 0x472   :  { %v820_v34 = vadd.f32 %v819_v30, %v818_v24  ;;  %1277 = vmatprep.subr.bf16.mxu1 %v1486_v0  ;;  %v1089_v0 = vrot.slane %v1832_v52, %v1801_v57 }
 0x474   :  { %v835_v38 = vsel %vm520_vm8, %v820_v34, %v834_v18  ;;  %v1096_v10 = vsel %vm520_vm8, %v1089_v0, %v1830_v50 }
 0x475   :  { %836 = vrot.lane.b32.xlu1 %v835_v38, %s1491_s6  ;;  %1279 = vmatpush3.bf16.msra.mxu1 %v1278_v59 }
 0x4e7   :  { %v837_v42 = vpop.permute.xlu1 %836 }
 0x4e8   :  { %v839_v39 = vsel %vm122_vm1, %v1642_v15, %v837_v42 }
 0x4e9   :  { %1221 = vmatmul.mubr.msk.f32.vlgmr.msra.gmra.mrb[2].mxu0 %vm855_vm10, %v839_v39 }
 0x5bc   :  { %v925_v44 = vpop.f32.mrb[2].mxu0 }
 0x5bd   :  { %v926_v25 = vadd.f32 %v1133_v43, %v925_v44  ;;  %v1222_v46 = vpop.f32.mrb[3].mxu0 }
 0x5bf   :  { %1331 = vtanh.f32 %v926_v25  ;;  %v1135_v19 = vmul.f32 -1.442695, %v926_v25 }
 0x5c1   :  { %1333 = vpow2.f32 %v1135_v19 }
 0x5c9   :  { %v1332_v36 = vpop.eup %1331 }
 0x5ca   :  { %942 = vrot.lane.b32.xlu0 %v1332_v36, %s1492_s17 }
 0x5cb   :  { %v1334_v40 = vpop.eup %1333 }
 0x5cc   :  { %v932_v1 = vadd.f32 1.0, %v1334_v40 }
 0x5ce   :  { %937 = vrot.lane.b32.xlu0 %v102_v63, %s1491_s6  ;;  %1335 = vrcp.f32 %v932_v1 }
 0x5d8   :  { %v1336_v15 = vpop.eup %1335 }
 0x63c   :  { %v943_v41 = vpop.permute.xlu0 %942 }
 0x63d   :  { %v945_v2 = vmul.f32 %v1336_v15, %v943_v41 }
 0x63f   :  { %947 = vrot.lane.b32.xlu0 %v945_v2, %s1491_s6 }
 0x640   :  { %v938_v45 = vpop.permute.xlu0 %937 }
 0x641   :  { %v940_v47 = vmul.f32 %v1336_v15, %v938_v45 }
 0x6b1   :  { %v948_v7 = vpop.permute.xlu0 %947 }
 0x6b2   :  { %v950_v48 = vadd.f32 %v948_v7, %v940_v47 }
 0x6b4   :  { %1337 = vtanh.f32 %v950_v48 }
 0x6be   :  { %v1338_v55 = vpop.eup %1337 }
 0x6bf   :  { %953 = vrot.lane.b32.xlu0 %v1338_v55, %s1492_s17 }
 0x731   :  { %v954_v60 = vpop.permute.xlu0 %953 }
 0x732   :  { %v956_v61 = vmul.f32 %v1336_v15, %v954_v60 }
 0x734   :  { %1050 = vrot.lane.b32.xlu0 %v956_v61, %s1492_s17  ;;  %958 = vrot.lane.b32.xlu1 %v956_v61, %s1491_s6 }
 0x738   :  { %1054 = vrot.lane.b32.xlu1 %v950_v48, %s1491_s6 }
 0x7a6   :  { %v959_v62 = vpop.permute.xlu1 %958  ;;  %v1051_v27 = vpop.permute.xlu0 %1050 }
 0x7a7   :  { %v961_v3 = vsel %vm122_vm1, %v959_v62, %v837_v42 }
 0x7a8   :  { %1240 = vmatmul.mubr.msk.f32.vlgmr.msra.gmra.mrb[8].mxu1 %vm855_vm10, %v961_v3 }
 0x7aa   :  { %v1055_v8 = vpop.permute.xlu1 %1054 }
 0x87b   :  { %v1046_v5 = vpop.f32.mrb[8].mxu1 }
 0x87c   :  { %v1047_v37 = vadd.f32 %v1136_v4, %v1046_v5  ;;  %v1241_v6 = vpop.f32.mrb[9].mxu1 }
 0x87e   :  { %v1098_v9 = vsel %vm122_vm1, %v1047_v37, %v1051_v27 }
 0x87f   :  { %v1099_v16 = vsel %vm855_vm10, %v1098_v9, %v1055_v8 }
 0x880   :  { %v1101_v11 = vsel %vm1100_vm11, %v1099_v16, %v1096_v10 }
 0x881   :  { %v1103_v12 = vsel %vm1102_vm12, %v1101_v11, 0.0 }
 0x882   :  { %1104 = vst [vmem:[#allocation11] sm:$0xff] %v1103_v12 }
 0x883   :  { %1460 = shalt.err (!%p1457_p2)
}
 0x884   :  { %s1461_s4 = scalar_lea.hbm %s1916_s11, 128 }
 0x885   :  { %p1462_p3 = scmp.ne.s32.totalorder %s1916_s11, %s1461_s4  ;;  %p1465_p4 = scmp.lt.u32.totalorder %s1461_s4, %s1916_s11 }
 0x887   :  { %p1467_p5 = pnand %p1465_p4, %p1462_p3 }
 0x889   :  { %1470 = shalt.err (!%p1467_p5)
}
 0x88a   :  { %1114 = dma.vmem_to_hbm [thread:$0]  %s1112_s16, 128, %s1916_s11, [#allocation4]  }
 0x88b   :  { %1477 = dma.done.wait [#allocation4], 128  }
 0x88c   :  { %1478 = vsyncadd [#allocation4], 4294967168 }
 0x88d   :  { %1118 = vsyncpa [#allocation3], 1 }
 0x88e   :  { %1119 = vsyncpa [#allocation6], 1 }
 0x88f   :  { %1120 = vsyncpa [#allocation9], 1 }
 0x890   :  { %1121 = vsyncpa [#allocation4], 1 }

</bundles_post_ra>
